<compile_context>
chip_gen: v7x
topology: tpu7x:2x2x1
jax: 0.10.0
libtpu: 0.0.40
codegen_flags: <defaults>
</compile_context>

<pallas_src>
import functools
import math

import jax
import jax.numpy as jnp
from jax import lax
from jax.experimental import pallas as pl
from jax.experimental.pallas import tpu as pltpu

_SUBLANE = 8
_INV_SQRT2 = 1.0 / math.sqrt(2.0)
_TANH_C = math.sqrt(2.0 / math.pi)


def _round_up(x, n):
    return ((x + n - 1) // n) * n


def _gelu_f32(h, approximate):
    if approximate:
        # tanh-based GELU -> EUP slot (nearly free vs the VALU erf polynomial)
        h3 = h * h * h
        return 0.5 * h * (1.0 + jnp.tanh(jnp.float32(_TANH_C)
                                         * (h + jnp.float32(0.044715) * h3)))
    # exact erf GELU (torch.nn.functional.gelu default)
    return 0.5 * h * (1.0 + lax.erf(h * jnp.float32(_INV_SQRT2)))


def _nonlinear_kernel(x_ref, w1_ref, b1_ref, w2_ref, b2_ref, o_ref, *, approximate):
    # x_ref:  (tile_m, d_in)    input row tile (HBM dtype)
    # w1_ref: (d_in, hidden)    resident, compute dtype
    # b1_ref: (1, hidden)       f32
    # w2_ref: (hidden, d_out)   resident, compute dtype
    # b2_ref: (1, d_out)        f32
    # o_ref:  (tile_m, d_out)
    cdt = w1_ref.dtype
    x = x_ref[...].astype(cdt)                       # per-tile cast, in VMEM
    h = jnp.dot(x, w1_ref[...], preferred_element_type=jnp.float32) + b1_ref[...]
    h = _gelu_f32(h, approximate)                    # f32 VPU/EUP work
    o = jnp.dot(h.astype(cdt), w2_ref[...], preferred_element_type=jnp.float32)
    o = o + b2_ref[...]
    o_ref[...] = o.astype(o_ref.dtype)


def _xla_forward(x, params, *, approximate):
    """Fallback when the resident weights cannot fit the VMEM budget."""
    # TODO(synk): tile the hidden dim inside the Pallas kernel (arbitrary grid
    # axis + f32 accumulator) instead of falling back to XLA for huge hidden.
    w1, b1, w2, b2 = params
    h = jnp.dot(x.astype(w1.dtype), w1, preferred_element_type=jnp.float32) + b1
    h = _gelu_f32(h, approximate)
    o = jnp.dot(h.astype(w2.dtype), w2, preferred_element_type=jnp.float32) + b2
    return o.astype(x.dtype)


def _default_vmem_limit_bytes():
    cap = None
    try:
        cap = getattr(pltpu.get_tpu_info(), "vmem_capacity_bytes", None)
    except Exception:
        cap = None
    if not cap:
        return 48 * 1024 * 1024                  # safe on v7x (64 MiB physical/TC)
    return int(min(cap * 3 // 4, 96 * 1024 * 1024))


def prepare_nonlinear_params(w1, b1, w2, b2, compute_dtype=jnp.bfloat16):
    """One-time cast/reshape of the parameters (do this at init, not per call).

    Weights are stored (in_features, out_features) and cast to `compute_dtype`
    (bf16 by default -> native MXU passes); biases stay f32, shaped (1, N).
    """
    cdt = jnp.dtype(compute_dtype)
    return (jnp.asarray(w1, cdt),
            jnp.asarray(b1, jnp.float32).reshape(1, -1),
            jnp.asarray(w2, cdt),
            jnp.asarray(b2, jnp.float32).reshape(1, -1))


def nonlinear_forward(x, params, *, tile_m=None, approximate_gelu=False,
                      vmem_limit_bytes=None):
    """x: (..., d_in) -> (..., d_out) with params = prepare_nonlinear_params(...)."""
    w1, b1, w2, b2 = params
    orig_shape = x.shape
    d_in = orig_shape[-1]
    hidden = w1.shape[1]
    d_out = w2.shape[1]
    assert w1.shape[0] == d_in and w2.shape[0] == hidden
    assert b1.shape == (1, hidden) and b2.shape == (1, d_out), \
        "pass params through prepare_nonlinear_params()"

    cdt = jnp.dtype(w1.dtype)
    out_dtype = x.dtype

    x2 = x.reshape(-1, d_in)                     # metadata-only reshape
    m = x2.shape[0]

    vmem_limit = (int(vmem_limit_bytes) if vmem_limit_bytes is not None
                  else _default_vmem_limit_bytes())

    x_bytes = jnp.dtype(x.dtype).itemsize
    out_bytes = jnp.dtype(out_dtype).itemsize
    c_bytes = cdt.itemsize

    # Single-buffered resident weights + f32 biases.
    weight_vmem = (d_in * hidden + hidden * d_out) * c_bytes + (hidden + d_out) * 4
    # Per-row VMEM: double-buffered in/out tiles + in-kernel casts + f32 h.
    per_row = (2 * d_in * x_bytes + 2 * d_out * out_bytes
               + d_in * c_bytes + hidden * (4 + c_bytes) + d_out * 4)
    budget = int(0.85 * vmem_limit) - weight_vmem
    if budget < per_row * _SUBLANE:
        return _xla_forward(x, params, approximate=approximate_gelu)

    tile_cap = max(_SUBLANE, (budget // per_row) // _SUBLANE * _SUBLANE)
    # Keep >= 2 grid steps: DMA/compute pipelining + dual-TensorCore on v7x.
    split_cap = _round_up(max(pl.cdiv(m, 2), _SUBLANE), _SUBLANE)
    if tile_m is None:
        tile_m = min(1024, tile_cap, split_cap)
    else:
        tile_m = _round_up(max(int(tile_m), _SUBLANE), _SUBLANE)   # (8,128) rule
        tile_m = min(tile_m, tile_cap, _round_up(m, _SUBLANE))
    tile_m = max(_SUBLANE, int(tile_m))

    grid_m = pl.cdiv(m, tile_m)                  # ragged last tile is masked

    cost = pl.CostEstimate(
        flops=2 * m * (d_in * hidden + hidden * d_out),
        transcendentals=m * hidden,
        bytes_accessed=(m * d_in * x_bytes
                        + (d_in * hidden + hidden * d_out) * c_bytes
                        + (hidden + d_out) * 4
                        + m * d_out * out_bytes),
    )

    def _const_spec(shape):
        # Constant index_map -> resident across the grid; single buffer.
        return pl.BlockSpec(shape, lambda i: (0, 0), pipeline_mode=pl.Buffered(1))

    kernel = functools.partial(_nonlinear_kernel, approximate=approximate_gelu)

    out2 = pl.pallas_call(
        kernel,
        out_shape=jax.ShapeDtypeStruct((m, d_out), out_dtype),
        grid_spec=pltpu.PrefetchScalarGridSpec(
            num_scalar_prefetch=0,
            grid=(grid_m,),
            in_specs=[
                pl.BlockSpec((tile_m, d_in), lambda i: (i, 0)),   # x row tile
                _const_spec((d_in, hidden)),                      # W1 (resident)
                _const_spec((1, hidden)),                         # b1
                _const_spec((hidden, d_out)),                     # W2 (resident)
                _const_spec((1, d_out)),                          # b2
            ],
            out_specs=pl.BlockSpec((tile_m, d_out), lambda i: (i, 0)),
        ),
        compiler_params=pltpu.CompilerParams(
            dimension_semantics=("parallel",),
            vmem_limit_bytes=vmem_limit,
        ),
        cost_estimate=cost,
    )(x2, w1, b1, w2, b2)

    return out2.reshape(*orig_shape[:-1], d_out)


def init_nonlinear_params(key, d_in, hidden, d_out, dtype=jnp.float32):
    """nn.Linear-style init (uniform +-1/sqrt(fan_in)); weights stored (in, out)."""
    k1, k2, k3, k4 = jax.random.split(key, 4)
    bound1 = 1.0 / math.sqrt(d_in)
    bound2 = 1.0 / math.sqrt(hidden)
    w1 = jax.random.uniform(k1, (d_in, hidden), dtype, -bound1, bound1)
    b1 = jax.random.uniform(k2, (hidden,), dtype, -bound1, bound1)
    w2 = jax.random.uniform(k3, (hidden, d_out), dtype, -bound2, bound2)
    b2 = jax.random.uniform(k4, (d_out,), dtype, -bound2, bound2)
    return w1, b1, w2, b2


if __name__ == "__main__":
    # NonLinear(input=32, output_size=16) with hidden=None -> hidden=32
    d_in, hidden, d_out = 32, 32, 16
    batch, seq = 2, 8                      # x: (2, 8, 32) -> 16 rows

    key = jax.random.PRNGKey(0)
    kx, kp = jax.random.split(key)
    x = jax.random.normal(kx, (batch, seq, d_in), dtype=jnp.float32)
    w1, b1, w2, b2 = init_nonlinear_params(kp, d_in, hidden, d_out)

    # Pure-JAX references (exact erf GELU = torch default; tanh-approx GELU)
    h_ref = x @ w1 + b1
    ref_exact = (0.5 * h_ref * (1.0 + lax.erf(h_ref / jnp.sqrt(2.0)))) @ w2 + b2
    h3 = h_ref * h_ref * h_ref
    ref_tanh = (0.5 * h_ref * (1.0 + jnp.tanh(_TANH_C * (h_ref + 0.044715 * h3)))
                ) @ w2 + b2

    # 1) f32 compute path, exact GELU -> tight tolerance vs reference
    params_f32 = prepare_nonlinear_params(w1, b1, w2, b2, compute_dtype=jnp.float32)
    out_f32 = jax.block_until_ready(nonlinear_forward(x, params_f32))
    assert out_f32.shape == (batch, seq, d_out)
    assert jnp.allclose(out_f32, ref_exact, atol=1e-5, rtol=1e-5), "f32 mismatch"

    # 2) default bf16 MXU compute (x/W quantized to bf16, f32 accumulation)
    params_bf16 = prepare_nonlinear_params(w1, b1, w2, b2)     # bf16 default
    out_bf16 = jax.block_until_ready(nonlinear_forward(x, params_bf16))
    assert jnp.allclose(out_bf16, ref_exact, atol=5e-2, rtol=5e-2), "bf16 mismatch"

    # 3) tanh-approximate GELU (EUP path), f32 compute -> vs tanh reference
    out_tanh = jax.block_until_ready(
        nonlinear_forward(x, params_f32, approximate_gelu=True))
    assert jnp.allclose(out_tanh, ref_tanh, atol=1e-4, rtol=1e-4), "tanh-gelu mismatch"

    print("KERNEL_OK")
</pallas_src>

<mosaic_0001>
module attributes {stable_mosaic.version = 11 : i64} {
  func.func @_nonlinear_kernel(%arg0: i32, %arg1: memref<8x32xf32, #tpu.memory_space<vmem>>, %arg2: memref<32x32xf32, #tpu.memory_space<vmem>>, %arg3: memref<1x32xf32, #tpu.memory_space<vmem>>, %arg4: memref<32x16xf32, #tpu.memory_space<vmem>>, %arg5: memref<1x16xf32, #tpu.memory_space<vmem>>, %arg6: memref<8x16xf32, #tpu.memory_space<vmem>>) attributes {dimension_semantics = [#tpu.dimension_semantics<parallel>], iteration_bounds = array<i64: 2>, scalar_prefetch = 0 : i64, scratch_operands = 0 : i64, tpu.core_type = #tpu.core_type<tc>, window_params = [{transform_indices = @transform_0, window_bounds = array<i64: 8, 32>}, {pipeline_mode = #tpu.pipeline_mode<synchronous>, transform_indices = @transform_1, window_bounds = array<i64: 32, 32>}, {pipeline_mode = #tpu.pipeline_mode<synchronous>, transform_indices = @transform_2, window_bounds = array<i64: 1, 32>}, {pipeline_mode = #tpu.pipeline_mode<synchronous>, transform_indices = @transform_3, window_bounds = array<i64: 32, 16>}, {pipeline_mode = #tpu.pipeline_mode<synchronous>, transform_indices = @transform_4, window_bounds = array<i64: 1, 16>}, {transform_indices = @transform_5, window_bounds = array<i64: 8, 16>}]} {
    %c0 = arith.constant 0 : index
    %c0_0 = arith.constant 0 : index
    %0 = vector.load %arg1[%c0, %c0_0] : memref<8x32xf32, #tpu.memory_space<vmem>>, vector<8x32xf32>
    %c0_1 = arith.constant 0 : index
    %c0_2 = arith.constant 0 : index
    %1 = vector.load %arg2[%c0_1, %c0_2] : memref<32x32xf32, #tpu.memory_space<vmem>>, vector<32x32xf32>
    %cst = arith.constant dense<0.000000e+00> : vector<8x32xf32>
    %2 = tpu.matmul %0, %1, %cst {dimension_numbers = #tpu.dot_dimension_numbers<[1], [0], [0], [1], [0, 0, 1, 1], [], []>} : vector<8x32xf32>, vector<32x32xf32>, vector<8x32xf32> -> vector<8x32xf32>
    %c0_3 = arith.constant 0 : index
    %c0_4 = arith.constant 0 : index
    %3 = vector.load %arg3[%c0_3, %c0_4] : memref<1x32xf32, #tpu.memory_space<vmem>>, vector<1x32xf32>
    %4 = vector.broadcast %3 : vector<1x32xf32> to vector<8x32xf32>
    %5 = arith.addf %2, %4 : vector<8x32xf32>
    %cst_5 = arith.constant 5.000000e-01 : f32
    %6 = vector.broadcast %cst_5 : f32 to vector<8x32xf32>
    %7 = arith.mulf %6, %5 : vector<8x32xf32>
    %cst_6 = arith.constant 0.707106769 : f32
    %8 = vector.broadcast %cst_6 : f32 to vector<8x32xf32>
    %9 = arith.mulf %5, %8 : vector<8x32xf32>
    %10 = math.erf %9 : vector<8x32xf32>
    %cst_7 = arith.constant 1.000000e+00 : f32
    %11 = vector.broadcast %cst_7 : f32 to vector<8x32xf32>
    %12 = arith.addf %11, %10 : vector<8x32xf32>
    %13 = arith.mulf %7, %12 : vector<8x32xf32>
    %c0_8 = arith.constant 0 : index
    %c0_9 = arith.constant 0 : index
    %14 = vector.load %arg4[%c0_8, %c0_9] : memref<32x16xf32, #tpu.memory_space<vmem>>, vector<32x16xf32>
    %cst_10 = arith.constant dense<0.000000e+00> : vector<8x16xf32>
    %15 = tpu.matmul %13, %14, %cst_10 {dimension_numbers = #tpu.dot_dimension_numbers<[1], [0], [0], [1], [0, 0, 1, 1], [], []>} : vector<8x32xf32>, vector<32x16xf32>, vector<8x16xf32> -> vector<8x16xf32>
    %c0_11 = arith.constant 0 : index
    %c0_12 = arith.constant 0 : index
    %16 = vector.load %arg5[%c0_11, %c0_12] : memref<1x16xf32, #tpu.memory_space<vmem>>, vector<1x16xf32>
    %17 = vector.broadcast %16 : vector<1x16xf32> to vector<8x16xf32>
    %18 = arith.addf %15, %17 : vector<8x16xf32>
    %c0_13 = arith.constant 0 : index
    %c0_14 = arith.constant 0 : index
    %19 = vector.load %arg6[%c0_13, %c0_14] : memref<8x16xf32, #tpu.memory_space<vmem>>, vector<8x16xf32>
    tpu.vector_store %arg6[%c0_13, %c0_14], %18 {strides = array<i32>} : memref<8x16xf32, #tpu.memory_space<vmem>>, vector<8x16xf32>,
    return
  }
  func.func @transform_0(%arg0: i32) -> (i32, i32) {
    %c0_i32 = arith.constant 0 : i32
    %c0_i32_0 = arith.constant 0 : i32
    return %arg0, %c0_i32 : i32, i32
  }
  func.func @transform_1(%arg0: i32) -> (i32, i32) {
    %c0_i32 = arith.constant 0 : i32
    %c0_i32_0 = arith.constant 0 : i32
    %c0_i32_1 = arith.constant 0 : i32
    return %c0_i32, %c0_i32_0 : i32, i32
  }
  func.func @transform_2(%arg0: i32) -> (i32, i32) {
    %c0_i32 = arith.constant 0 : i32
    %c0_i32_0 = arith.constant 0 : i32
    %c0_i32_1 = arith.constant 0 : i32
    return %c0_i32, %c0_i32_0 : i32, i32
  }
  func.func @transform_3(%arg0: i32) -> (i32, i32) {
    %c0_i32 = arith.constant 0 : i32
    %c0_i32_0 = arith.constant 0 : i32
    %c0_i32_1 = arith.constant 0 : i32
    return %c0_i32, %c0_i32_0 : i32, i32
  }
  func.func @transform_4(%arg0: i32) -> (i32, i32) {
    %c0_i32 = arith.constant 0 : i32
    %c0_i32_0 = arith.constant 0 : i32
    %c0_i32_1 = arith.constant 0 : i32
    return %c0_i32, %c0_i32_0 : i32, i32
  }
  func.func @transform_5(%arg0: i32) -> (i32, i32) {
    %c0_i32 = arith.constant 0 : i32
    %c0_i32_0 = arith.constant 0 : i32
    return %arg0, %c0_i32 : i32, i32
  }
}

</mosaic_0001>

<bundles_post_ra>
// kernel: tpu_custom_call.1
= control target key start
LH: loop header
LB: loop body
LE: loop exit
PB: predicated region body
PF: predicated region fallthrough
CT: control target
= control target key end

     0   :  { %10 = vsyncpa [#allocation3], 0  ;;  %s802_s0 = inlined_call_operand.vmem [shape: f32[16,32], index: 0, kind: input, shape index: {}]   ;;  %s803_s1 = inlined_call_operand.vmem [shape: f32[32,32], index: 1, kind: input, shape index: {}]   ;;  %s804_s2 = inlined_call_operand.vmem [shape: f32[1,32], index: 2, kind: input, shape index: {}]   ;;  %s805_s3 = inlined_call_operand.vmem [shape: f32[32,16], index: 3, kind: input, shape index: {}]   ;;  %s806_s4 = inlined_call_operand.vmem [shape: f32[1,16], index: 4, kind: input, shape index: {}]   ;;  %s807_s5 = inlined_call_operand.hbm [shape: f32[16,16], index: 5, kind: output, shape index: {}]  }
   0x1   :  { %12 = vsyncpa [#allocation3 + $0x1], 0  ;;  %s670_s18 = smov 0   ;;  %s672_s19 = smov 0  }
   0x2   :  { %s674_s20 = smov 0   ;;  %s676_s21 = smov 0  }
   0x3 LB: > { %s691_s22 = sadd.s32 4294967295, %s634_s21   ;;  %s470_s23 = sadd.s32 4294967294, %s634_s21   ;;  %s634_s21 = sphi %s676_s21, %s813_s21   ;;  %s630_s20 = sphi %s674_s20, %s812_s20   ;;  %s626_s19 = sphi %s672_s19, %s811_s19   ;;  %s622_s18 = sphi %s670_s18, %s810_s18  }
   0x4   : > { %s695_s24 = sadd.s32 1, %s634_s21   ;;  %s135_s25 = sadd.s32 1, %s630_s20 }
   0x5   : > { %s132_s26 = ssub.s32 %s634_s21, %s695_s24  ;;  %p145_p0 = scmp.ne.s32.totalorder %s630_s20, %s626_s19 }
   0x6   : > { %p133_p1 = scmp.eq.s32.totalorder %s132_s26, 0  ;;  %p146_p2 = scmp.eq.s32.totalorder %s691_s22, 1 }
   0x7   : > { %p151_p3 = scmp.ne.s32.totalorder %s626_s19, %s622_s18  ;;  %p152_p4 = scmp.eq.s32.totalorder %s470_s23, 1 }
   0x8   : > { %s706_s27 = scalar_select %p133_p1, %s630_s20, %s135_s25  }
   0x9   : > { %p708_p5 = por %p146_p2, %p145_p0  ;;  %p712_p6 = por %p152_p4, %p151_p3 }
   0xa   : > { %p473_p7 = scmp.ge.s32.totalorder %s634_s21, 1  ;;  %p189_p8 = scmp.lt.s32.totalorder %s634_s21, 3 }
   0xc   : > { %p190_p9 = pnand %p473_p7, %p189_p8 }
   0xd   : > { %v221_v0 = vld [vmem:[%s803_s1] sm:$0xff] (!%p190_p9)  ;;  %v222_v1 = vld [vmem:[%s803_s1 + $0x8] sm:$0xff] (!%p190_p9)  ;;  %v223_v2 = vld [vmem:[%s803_s1 + $0x10] sm:$0xff] (!%p190_p9)  ;;  %v636_v3 = vmov (!%p190_p9), 0.0|0.0   ;;  %vm637_vm0 = vmmov (!%p190_p9), 0   ;;  %v638_v6 = vmov (!%p190_p9), 0.0  }
   0xe   : > { %193 = sbr.rel (%p190_p9) target bundleno = 485 (0x1e5), region = 40  ;;  %516 = vmatprep.subr.bf16.mxu0 (!%p190_p9), %v636_v3  ;;  %v517_v4 = vpack.c.bf16 (!%p190_p9), %v222_v1, %v221_v0  ;;  %v224_v5 = vld [vmem:[%s803_s1 + $0x18] sm:$0xff] (!%p190_p9)  ;;  %502 = vmatprep.mubr.msk.f32.mxu0 (!%p190_p9), %vm637_vm0, %v638_v6  ;;  %p216_p10 = scmp.lt.s32.totalorder (!%p190_p9), %s691_s22, 1  ;;  %vm232_vm1 = vcmask (!%p190_p9), 261120   ;;  %v311_v9 = vld [vmem:[%s805_s3] sm:$0xff] (!%p190_p9)  ;;  %v312_v10 = vld [vmem:[%s805_s3 + $0x8] sm:$0xff] (!%p190_p9) }
   0xf   : > { %522 = vmatprep.subr.bf16.mxu1 (!%p190_p9), %v636_v3  ;;  %513 = vmatprep.mubr.msk.f32.mxu1 (!%p190_p9), %vm637_vm0, %v638_v6  ;;  %v520_v7 = vpack.c.bf16 (!%p190_p9), %v224_v5, %v223_v2  ;;  %v523_v11 = vpack.c.bf16 (!%p190_p9), %v312_v10, %v311_v9  ;;  %v313_v12 = vld [vmem:[%s805_s3 + $0x10] sm:$0xff] (!%p190_p9)  ;;  %v314_v13 = vld [vmem:[%s805_s3 + $0x18] sm:$0xff] (!%p190_p9)  ;;  %v476_v15 = vld [vmem:[%s804_s2] ss:$0 sm:$0xff] (!%p190_p9)  ;;  %s213_s12 = sand.u32 (!%p190_p9), 1, %s626_s19   ;;  %s481_s16 = sshll.u32 (!%p190_p9), %s691_s22, 7 }
  0x10   : > { %518 = vmatpush3.bf16.msra.mxu0 (!%p190_p9), %v517_v4  ;;  %v526_v14 = vpack.c.bf16 (!%p190_p9), %v314_v13, %v313_v12  ;;  %v478_v24 = vld [vmem:[%s806_s4] ss:$0 sm:$0xff] (!%p190_p9)  ;;  %vm395_vm2 = vcmask (!%p190_p9), 130048   ;;  %s760_s30 = scalar_lea.hbm (!%p190_p9), %s807_s5, %s481_s16  ;;  %s398_s6 = scalar_lea.sflag (!%p190_p9), [#allocation3], %s213_s12 }
  0x11   : > { %519 = vmatprep.subr.bf16.mxu0 (!%p190_p9), %v636_v3  ;;  %524 = vmatpush3.bf16.msra.mxu1 (!%p190_p9), %v523_v11 }
  0x12   : > { %525 = vmatprep.subr.bf16.mxu1 (!%p190_p9), %v636_v3 }
  0x14   : > { %521 = vmatpush3.bf16.msra.mxu0 (!%p190_p9), %v520_v7 }
  0x15   : > { %s217_s13 = scalar_select %p216_p10, %s691_s22, 1  ;;  %527 = vmatpush3.bf16.msra.mxu1 %v526_v14 }
  0x16   : > { %s639_s22 = smov [#allocation2]  }
  0x17   : > { %s475_s14 = sshll.u32 %s217_s13, 3  ;;  %s474_s13 = sshll.u32 %s213_s12, 3 }
  0x18   : > { %s219_s17 = scalar_lea.vmem %s802_s0, %s475_s14  ;;  %s576_s8 = sshll.u32 %s639_s22, 4  ;;  %s577_s8 = int_to_ptr.vmem [resolvable:$false] %s576_s8 }
  0x19   : > { %v220_v8 = vld [vmem:[%s219_s17] sm:$0xff]  ;;  %s215_s17 = scalar_lea.vmem [#allocation2], %s474_s13  ;;  %s578_s9 = scalar_lea.vmem %s577_s8, 256 }
  0x1a   : > { %503 = vmatmul.mubr.msk.f32.vlgmr.msra.gmra.mrb[0].mxu0 %vm232_vm1, %v220_v8  ;;  %s411_s23 = sshll.u32 %s215_s17, 4  ;;  %s762_s23 = int_to_ptr.vmem [resolvable:$true] %s411_s23 }
  0x1b   : > { %s572_s7 = scalar_lea.vmem %s762_s23, 128  ;;  %p579_p0 = scmp.lt.s32.totalorder %s762_s23, %s577_s8 }
  0x1c   : > { %p573_p11 = scmp.ne.s32.totalorder %s762_s23, %s572_s7  ;;  %p580_p1 = scmp.lt.s32.totalorder %s578_s9, %s572_s7 }
  0x1e   : > { %p574_p12 = pnand %p573_p11, %p708_p5  ;;  %p581_p2 = por %p580_p1, %p579_p0 }
  0x20   : > { %p575_p13 = pneg %p574_p12 }
  0x22   : > { %p582_p3 = pnand %p581_p2, %p575_p13 }
  0xed   : > { %v302_v16 = vpop.f32.mrb[0].mxu0 }
  0xee   : > { %v303_v17 = vadd.f32 %v476_v15, %v302_v16  ;;  %v504_v18 = vpop.f32.mrb[1].mxu0 }
  0xf0   : > { %v307_v19 = vmul.f32 0.70710677, %v303_v17  ;;  %v306_v21 = vmul.f32 0.5, %v303_v17 }
  0xf2   : > { %570 = verf.f32 %v307_v19 }
  0xfc   : > { %v571_v20 = vpop.eup %570 }
  0xfd   : > { %v309_v22 = vadd.f32 1.0, %v571_v20 }
  0xff   : > { %v310_v23 = vmul.f32 %v309_v22, %v306_v21 }
 0x101   : > { %514 = vmatmul.mubr.msk.f32.vlgmr.msra.gmra.mrb[0].mxu1 %vm232_vm1, %v310_v23 }
 0x1d4   : > { %v391_v25 = vpop.f32.mrb[0].mxu1 }
 0x1d5   : > { %v392_v26 = vadd.f32 %v478_v24, %v391_v25  ;;  %v515_v27 = vpop.f32.mrb[1].mxu1 }
 0x1d7   : > { %396 = vst.msk [vmem:[%s215_s17] sm:$0xff] %vm395_vm2, %v392_v26 }
 0x1d8   : > { %585 = shalt.err (!%p582_p3)
}
 0x1d9   : > { %s586_s10 = scalar_lea.hbm %s760_s30, 128  ;;  %s590_s13 = scalar_lea.hbm %s807_s5, 256 }
 0x1da   : > { %p587_p4 = scmp.ne.s32.totalorder %s760_s30, %s586_s10  ;;  %p591_p9 = scmp.lt.u32.totalorder %s760_s30, %s807_s5 }
 0x1db   : > { %p592_p10 = scmp.lt.u32.totalorder %s590_s13, %s586_s10  ;;  %p594_p12 = scmp.lt.u32.totalorder %s586_s10, %s760_s30 }
 0x1dc   : > { %p588_p7 = pnand %p587_p4, %p708_p5 }
 0x1dd   : > { %p593_p11 = por %p592_p10, %p591_p9 }
 0x1de   : > { %p589_p8 = pneg %p588_p7 }
 0x1df   : > { %p595_p13 = por %p594_p12, %p593_p11 }
 0x1e1   : > { %p596_p0 = pnand %p595_p13, %p589_p8 }
 0x1e3   : > { %599 = shalt.err (!%p596_p0)
}
 0x1e4   : > { %528 = dma.vmem_to_hbm [thread:$0]  (%p708_p5), %s762_s23, 128, %s760_s30, %s398_s6  }
 0x1e5 PF: > { %p534_p1 = scmp.ge.s32.totalorder %s634_s21, 2  ;;  %s423_s16 = sand.u32 1, %s622_s18  }
 0x1e6   : > { %s424_s17 = scalar_lea.sflag [#allocation3], %s423_s16 }
 0x1e7   : > { %p531_p2 = pnand %p534_p1, %p712_p6 }
 0x1e9   : > { %617 = dma.done.wait (!%p531_p2), %s424_s17, 128  }
 0x1ea   : > { %619 = vsyncadd (!%p531_p2), %s424_s17, 4294967168  ;;  %p15_p3 = scmp.ge.s32.totalorder %s695_s24, 4   ;;  %s810_s18 = smov %s626_s19 }
 0x1eb   : > { %s811_s19 = smov %s630_s20  ;;  %s812_s20 = smov %s706_s27 }
 0x1ec   : > { %s813_s21 = smov %s695_s24  ;;  %17 = sbr.rel (!%p15_p3) target bundleno = 3 (0x3), region = 75 }
 0x1f3   :  { %429 = vsyncpa [#allocation3], 1 }
 0x1f4   :  { %431 = vsyncpa [#allocation3 + $0x1], 1 }

</bundles_post_ra>
